<compile_context>
chip_gen: v6e
topology: v6e:2x2x1
jax: 0.10.0
libtpu: 0.0.40
codegen_flags: <defaults>
</compile_context>

<pallas_src>
import functools

import jax
import jax.numpy as jnp
from jax import lax
from jax.experimental import pallas as pl
from jax.experimental.pallas import tpu as pltpu

# ----- deterministic "module parameters" (no learnable weights in __init__) --
PAD_ID = 0          # tokenizer.pad
CLS_ID = 1          # tokenizer.cls
SEQ_W = 1.0         # config.get('seq', 1.0)
COORD_W = 1.0       # config.get('coord', 1.0)

# Finite stand-in for -inf: avoids NaN from (-inf) - (-inf) in the online max.
_NEG_BIG = float(jnp.finfo(jnp.float32).min)


def _tile(dim, align, cap):
    """Block size along one dim: the full extent if it fits the cap (a
    full-extent block is always legal regardless of alignment), otherwise the
    largest multiple of `align` <= cap; the remainder is handled by a cdiv
    grid with masked tail blocks (no full-extent fallback blowups)."""
    if dim <= cap:
        return dim
    return max(align, (cap // align) * align)


# ----------------------- log-sum-exp (cross-entropy) kernel ------------------
def _lse_kernel(logits_ref, lse_ref, m_scr, l_scr, *, vocab_tile, v_total, has_tail):
    v = pl.program_id(1)

    @pl.when(v == 0)
    def _():
        m_scr[...] = jnp.full_like(m_scr, _NEG_BIG)
        l_scr[...] = jnp.zeros_like(l_scr)

    x = logits_ref[...].astype(jnp.float32)            # (TR, TV): cast after the load

    if has_tail:  # static python flag: only emitted when V % vocab_tile != 0
        col = lax.broadcasted_iota(jnp.int32, x.shape, 1)
        limit = v_total - v * vocab_tile               # scalar; >= vocab_tile except tail
        x = jnp.where(col < limit, x, _NEG_BIG)

    # online softmax accumulation over vocab tiles
    m_prev = m_scr[...]
    m_new = jnp.maximum(m_prev, jnp.max(x, axis=-1, keepdims=True))
    l_scr[...] = l_scr[...] * jnp.exp(m_prev - m_new) + \
        jnp.sum(jnp.exp(x - m_new), axis=-1, keepdims=True)
    m_scr[...] = m_new

    @pl.when(v == pl.num_programs(1) - 1)
    def _():
        lse_ref[...] = m_scr[...] + jnp.log(l_scr[...])


def _token_logsumexp(logits2d, *, max_row_tile, max_vocab_tile, vmem_limit_bytes):
    """Per-row log-sum-exp (f32) of (R, V) logits streamed tile-by-tile."""
    R, V = logits2d.shape
    tr = _tile(R, 8, max_row_tile)
    tv = _tile(V, 128, max_vocab_tile)
    grid = (pl.cdiv(R, tr), pl.cdiv(V, tv))
    has_tail = (V % tv) != 0

    kernel = functools.partial(_lse_kernel, vocab_tile=tv, v_total=V, has_tail=has_tail)
    lse = pl.pallas_call(
        kernel,
        out_shape=jax.ShapeDtypeStruct((R, 1), jnp.float32),
        grid_spec=pltpu.PrefetchScalarGridSpec(
            num_scalar_prefetch=0,
            grid=grid,
            in_specs=[pl.BlockSpec((tr, tv), lambda r, v: (r, v))],
            out_specs=pl.BlockSpec((tr, 1), lambda r, v: (r, 0)),
            scratch_shapes=[pltpu.VMEM((tr, 1), jnp.float32)] * 2,
        ),
        compiler_params=pltpu.CompilerParams(
            dimension_semantics=("parallel", "arbitrary"),
            vmem_limit_bytes=vmem_limit_bytes,
        ),
    )(logits2d)
    return lse[:, 0]


# ------------------------- coordinate squared-diff kernel --------------------
def _sqdiff_kernel(p_ref, t_ref, o_ref):
    d = p_ref[...].astype(jnp.float32) - t_ref[...].astype(jnp.float32)
    o_ref[...] = d * d


def _coord_sqdiff(coord_pred, coords, *, max_row_tile=256, max_lane_tile=4096):
    """Elementwise (pred - tgt)^2 on free lane-dense (B, L*A*3) views (f32)."""
    B = coord_pred.shape[0]
    n3 = coord_pred.size // B
    p2 = coord_pred.reshape(B, n3)      # contiguous views: no transposes / repeats
    t2 = coords.reshape(B, n3)

    tb = _tile(B, 8, max_row_tile)
    tn = _tile(n3, 128, max_lane_tile)
    grid = (pl.cdiv(B, tb), pl.cdiv(n3, tn))

    sq = pl.pallas_call(
        _sqdiff_kernel,
        out_shape=jax.ShapeDtypeStruct((B, n3), jnp.float32),
        grid_spec=pltpu.PrefetchScalarGridSpec(
            num_scalar_prefetch=0,
            grid=grid,
            in_specs=[pl.BlockSpec((tb, tn), lambda i, j: (i, j)),
                      pl.BlockSpec((tb, tn), lambda i, j: (i, j))],
            out_specs=pl.BlockSpec((tb, tn), lambda i, j: (i, j)),
        ),
        compiler_params=pltpu.CompilerParams(
            dimension_semantics=("parallel", "parallel"),
            vmem_limit_bytes=32 * 1024 * 1024,
        ),
    )(p2, t2)
    return sq


# -------------------------------- module wrapper -----------------------------
def next_token_loss(logits_blv, tokens, coord_pred, coords, *,
                    pad_id=PAD_ID, cls_id=CLS_ID, seq_w=SEQ_W, coord_w=COORD_W,
                    max_row_tile=256, max_vocab_tile=16384,
                    vmem_limit_bytes=48 * 1024 * 1024):
    """logits_blv: (B, L, V) class-last logits (native dtype, e.g. bf16);
    tokens: (B, L) int; coord_pred / coords: (B, L, A, 3) float."""
    B, L, V = logits_blv.shape
    assert B == L, "module's seq_loss * loss_mask broadcast requires B == L"
    assert coord_pred.shape == coords.shape and coord_pred.shape[:2] == (B, L)
    assert coord_pred.shape[-1] == 3
    A = coord_pred.shape[2]

    tokens = tokens.astype(jnp.int32)
    mask_f = jnp.logical_and(tokens != pad_id, tokens != cls_id).astype(jnp.float32)

    # ---- cross entropy: streamed LSE kernel + tiny O(B*L) target-logit gather
    lse = _token_logsumexp(
        logits_blv.reshape(B * L, V),
        max_row_tile=max_row_tile, max_vocab_tile=max_vocab_tile,
        vmem_limit_bytes=vmem_limit_bytes).reshape(B, L)
    tgt_logit = jnp.take_along_axis(logits_blv, tokens[..., None], axis=-1)[..., 0]
    ce = lse - tgt_logit.astype(jnp.float32)                      # (B, L) per-token CE

    # ---- coord MSE: lane-dense elementwise kernel; 3-sum + mask in epilogue --
    sq = _coord_sqdiff(coord_pred, coords)                        # (B, L*A*3)
    coord_rows = jnp.sum(sq.reshape(B, L, A, 3), axis=-1) * mask_f[:, :, None]  # (B,L,A)

    # ---- tiny epilogue (O(B*L*A) elements): plain XLA scalar reductions ------
    seq_loss = jnp.sum(ce, axis=-1)                               # (B,)
    mask_sum = jnp.sum(mask_f)
    # torch broadcast quirk: (B,) * (B, L) -> result[i, j] = seq_loss[j] * mask[i, j]
    reduced_seq = jnp.sum(seq_loss * mask_f) / mask_sum
    coord_sum = jnp.sum(coord_rows)
    # keep the mask_sum factors so mask_sum == 0 yields NaN exactly like torch
    reduced_coord = (coord_sum * mask_sum) / (mask_sum * 3.0)

    return {
        "loss": seq_w * reduced_seq + coord_w * reduced_coord,
        "seq_loss": seq_loss,                     # (B,)      torch: per-batch CE sum
        "coord_loss": coord_rows.reshape(-1),     # (B*L*A,)  torch: per-atom masked SSE
    }


# -------------------------------- reference check ----------------------------
def _reference_loss(logits_blv, tokens, coord_pred, coords):
    """Plain-JAX mirror of the torch code (class-last logits layout)."""
    mask = jnp.logical_and(tokens != PAD_ID, tokens != CLS_ID)
    logp = jax.nn.log_softmax(logits_blv.astype(jnp.float32), axis=-1)
    ce = -jnp.take_along_axis(logp, tokens[..., None], axis=-1)[..., 0]   # (B, L)
    seq_loss = ce.sum(axis=-1)                                            # (B,)
    reduced_seq = jnp.sum(seq_loss * mask) / jnp.sum(mask)
    m4 = mask[..., None, None]
    diff = (coord_pred * m4).reshape(-1, 3) - (coords * m4).reshape(-1, 3)
    coord_loss = jnp.sum(diff * diff, axis=-1)                            # (B*L*A,)
    reduced_coord = jnp.sum(coord_loss * mask.reshape(-1)[:, None]) / (jnp.sum(mask) * 3)
    return (SEQ_W * reduced_seq + COORD_W * reduced_coord, seq_loss, coord_loss)


def _check(out, ref, B, L, A):
    ref_loss, ref_seq, ref_coord = ref
    assert out["seq_loss"].shape == (B,)
    assert out["coord_loss"].shape == (B * L * A,)
    assert jnp.allclose(out["loss"], ref_loss, rtol=1e-4, atol=1e-4), (out["loss"], ref_loss)
    assert jnp.allclose(out["seq_loss"], ref_seq, rtol=1e-4, atol=1e-4)
    assert jnp.allclose(out["coord_loss"], ref_coord, rtol=1e-4, atol=1e-4)


if __name__ == "__main__":
    B, L, V, A = 8, 8, 1024, 3     # B == L required by the module's own broadcast

    key = jax.random.PRNGKey(0)
    k1, k2, k3, k4 = jax.random.split(key, 4)

    # bf16 logits in class-last layout (no wrapper transpose / upcast needed)
    logits = jax.random.normal(k1, (B, L, V), dtype=jnp.float32).astype(jnp.bfloat16)
    tokens = jax.random.randint(k2, (B, L), 2, V, dtype=jnp.int32)
    tokens = tokens.at[:, 0].set(PAD_ID).at[:, 1].set(CLS_ID)   # left pad + cls
    coord_pred = jax.random.normal(k3, (B, L, A, 3), dtype=jnp.float32)
    coords = jax.random.normal(k4, (B, L, A, 3), dtype=jnp.float32)

    # 1) default caps: single vocab tile / single row tile path
    out = next_token_loss(logits, tokens, coord_pred, coords)
    jax.block_until_ready(out)
    _check(out, _reference_loss(logits, tokens, coord_pred, coords), B, L, A)

    # 2) small caps: multi row-tile x multi vocab-tile online-softmax path (no tails)
    out = next_token_loss(logits, tokens, coord_pred, coords,
                          max_row_tile=32, max_vocab_tile=256)
    jax.block_until_ready(out)
    _check(out, _reference_loss(logits, tokens, coord_pred, coords), B, L, A)

    # 3) non-dividing tiles: cdiv grids with masked vocab tail + dropped row tail
    V2 = 1000                                   # not a multiple of 128
    logits2 = logits[:, :, :V2]
    tokens2 = jnp.clip(tokens, 0, V2 - 1)
    out = next_token_loss(logits2, tokens2, coord_pred, coords,
                          max_row_tile=24, max_vocab_tile=384)
    jax.block_until_ready(out)
    _check(out, _reference_loss(logits2, tokens2, coord_pred, coords), B, L, A)

    print("KERNEL_OK")
</pallas_src>

<mosaic_0001>
module attributes {stable_mosaic.version = 11 : i64} {
  func.func @_lse_kernel(%arg0: i32, %arg1: i32, %arg2: memref<64x1024xbf16, #tpu.memory_space<vmem>>, %arg3: memref<64x1xf32, #tpu.memory_space<vmem>>, %arg4: memref<64x1xf32, #tpu.memory_space<vmem>>, %arg5: memref<64x1xf32, #tpu.memory_space<vmem>>) attributes {dimension_semantics = [#tpu.dimension_semantics<parallel>, #tpu.dimension_semantics<arbitrary>], iteration_bounds = array<i64: 1, 1>, scalar_prefetch = 0 : i64, scratch_operands = 2 : i64, tpu.core_type = #tpu.core_type<tc>, window_params = [{transform_indices = @transform_0, window_bounds = array<i64: 64, 1024>}, {transform_indices = @transform_1, window_bounds = array<i64: 64, 1>}]} {
    %c0_i32 = arith.constant 0 : i32
    %0 = arith.cmpi eq, %arg1, %c0_i32 : i32
    %1 = arith.extui %0 : i1 to i32
    %c0_i32_0 = arith.constant 0 : i32
    %2 = arith.cmpi ne, %1, %c0_i32_0 : i32
    scf.if %2 {
      %cst_13 = arith.constant -3.40282347E+38 : f32
      %24 = vector.broadcast %cst_13 : f32 to vector<64x1xf32>
      %c0_14 = arith.constant 0 : index
      %c0_15 = arith.constant 0 : index
      %25 = vector.load %arg4[%c0_14, %c0_15] : memref<64x1xf32, #tpu.memory_space<vmem>>, vector<64x1xf32>
      tpu.vector_store %arg4[%c0_14, %c0_15], %24 {strides = array<i32>} : memref<64x1xf32, #tpu.memory_space<vmem>>, vector<64x1xf32>,
      %cst_16 = arith.constant 0.000000e+00 : f32
      %26 = vector.broadcast %cst_16 : f32 to vector<64x1xf32>
      %c0_17 = arith.constant 0 : index
      %c0_18 = arith.constant 0 : index
      %27 = vector.load %arg5[%c0_17, %c0_18] : memref<64x1xf32, #tpu.memory_space<vmem>>, vector<64x1xf32>
      tpu.vector_store %arg5[%c0_17, %c0_18], %26 {strides = array<i32>} : memref<64x1xf32, #tpu.memory_space<vmem>>, vector<64x1xf32>,
    } else {
    }
    %c0 = arith.constant 0 : index
    %c0_1 = arith.constant 0 : index
    %3 = vector.load %arg2[%c0, %c0_1] : memref<64x1024xbf16, #tpu.memory_space<vmem>>, vector<64x1024xbf16>
    %4 = arith.extf %3 : vector<64x1024xbf16> to vector<64x1024xf32>
    %c0_2 = arith.constant 0 : index
    %c0_3 = arith.constant 0 : index
    %5 = vector.load %arg4[%c0_2, %c0_3] : memref<64x1xf32, #tpu.memory_space<vmem>>, vector<64x1xf32>
    %cst = arith.constant dense<0xFF800000> : vector<64xf32>
    %6 = vector.multi_reduction <maximumf>, %4, %cst [1] : vector<64x1024xf32> to vector<64xf32>
    %7 = vector.shape_cast %6 : vector<64xf32> to vector<64x1xf32>
    %8 = arith.maximumf %5, %7 : vector<64x1xf32>
    %c0_4 = arith.constant 0 : index
    %c0_5 = arith.constant 0 : index
    %9 = vector.load %arg5[%c0_4, %c0_5] : memref<64x1xf32, #tpu.memory_space<vmem>>, vector<64x1xf32>
    %10 = arith.subf %5, %8 : vector<64x1xf32>
    %11 = math.exp %10 : vector<64x1xf32>
    %12 = arith.mulf %9, %11 : vector<64x1xf32>
    %13 = vector.broadcast %8 : vector<64x1xf32> to vector<64x1024xf32>
    %14 = arith.subf %4, %13 : vector<64x1024xf32>
    %15 = math.exp %14 : vector<64x1024xf32>
    %cst_6 = arith.constant dense<0.000000e+00> : vector<64xf32>
    %16 = vector.multi_reduction <add>, %15, %cst_6 [1] : vector<64x1024xf32> to vector<64xf32>
    %17 = vector.shape_cast %16 : vector<64xf32> to vector<64x1xf32>
    %18 = arith.addf %12, %17 : vector<64x1xf32>
    %c0_7 = arith.constant 0 : index
    %c0_8 = arith.constant 0 : index
    %19 = vector.load %arg5[%c0_7, %c0_8] : memref<64x1xf32, #tpu.memory_space<vmem>>, vector<64x1xf32>
    tpu.vector_store %arg5[%c0_7, %c0_8], %18 {strides = array<i32>} : memref<64x1xf32, #tpu.memory_space<vmem>>, vector<64x1xf32>,
    %c0_9 = arith.constant 0 : index
    %c0_10 = arith.constant 0 : index
    %20 = vector.load %arg4[%c0_9, %c0_10] : memref<64x1xf32, #tpu.memory_space<vmem>>, vector<64x1xf32>
    tpu.vector_store %arg4[%c0_9, %c0_10], %8 {strides = array<i32>} : memref<64x1xf32, #tpu.memory_space<vmem>>, vector<64x1xf32>,
    %c0_i32_11 = arith.constant 0 : i32
    %21 = arith.cmpi eq, %arg1, %c0_i32_11 : i32
    %22 = arith.extui %21 : i1 to i32
    %c0_i32_12 = arith.constant 0 : i32
    %23 = arith.cmpi ne, %22, %c0_i32_12 : i32
    scf.if %23 {
      %c0_13 = arith.constant 0 : index
      %c0_14 = arith.constant 0 : index
      %24 = vector.load %arg4[%c0_13, %c0_14] : memref<64x1xf32, #tpu.memory_space<vmem>>, vector<64x1xf32>
      %c0_15 = arith.constant 0 : index
      %c0_16 = arith.constant 0 : index
      %25 = vector.load %arg5[%c0_15, %c0_16] : memref<64x1xf32, #tpu.memory_space<vmem>>, vector<64x1xf32>
      %26 = math.log %25 : vector<64x1xf32>
      %27 = arith.addf %24, %26 : vector<64x1xf32>
      %c0_17 = arith.constant 0 : index
      %c0_18 = arith.constant 0 : index
      %28 = vector.load %arg3[%c0_17, %c0_18] : memref<64x1xf32, #tpu.memory_space<vmem>>, vector<64x1xf32>
      tpu.vector_store %arg3[%c0_17, %c0_18], %27 {strides = array<i32>} : memref<64x1xf32, #tpu.memory_space<vmem>>, vector<64x1xf32>,
    } else {
    }
    return
  }
  func.func @transform_0(%arg0: i32, %arg1: i32) -> (i32, i32) {
    %c0_i32 = arith.constant 0 : i32
    return %arg0, %arg1 : i32, i32
  }
  func.func @transform_1(%arg0: i32, %arg1: i32) -> (i32, i32) {
    %c0_i32 = arith.constant 0 : i32
    %c0_i32_0 = arith.constant 0 : i32
    return %arg0, %c0_i32 : i32, i32
  }
}

</mosaic_0001>

<bundles_post_ra>
// kernel: tpu_custom_call.1
= control target key start
LH: loop header
LB: loop body
LE: loop exit
PB: predicated region body
PF: predicated region fallthrough
CT: control target
= control target key end

     0   :  { %6 = vsyncpa [#allocation5], 0  ;;  %s842_s6 = smov [#allocation4]   ;;  %s1587_s0 = inlined_call_operand.hbm [shape: bf16[64,1024], index: 0, kind: input, shape index: {}]   ;;  %s1588_s1 = inlined_call_operand.vmem [shape: f32[64,1], index: 1, kind: output, shape index: {}]  }
   0x1   :  { %s12_s7 = sshll.u32 %s842_s6, 4  ;;  %s13_s7 = int_to_ptr.vmem [resolvable:$true] %s12_s7 }
   0x2   :  { %s828_s8 = scalar_lea.vmem %s13_s7, 4096  ;;  %p833_p1 = scmp.lt.s32.totalorder %s13_s7, %s13_s7 }
   0x3   :  { %p829_p0 = scmp.ne.s32.totalorder %s13_s7, %s828_s8  ;;  %p834_p2 = scmp.lt.s32.totalorder %s828_s8, %s828_s8 }
   0x5   :  { %p835_p3 = por %p834_p2, %p833_p1 }
   0x7   :  { %p836_p4 = pnand %p835_p3, %p829_p0 }
   0x9   :  { %839 = shalt.err (!%p836_p4)
}
   0xa   :  { %s843_s9 = smov 512   ;;  %s844_s10 = smov 32  }
   0xb   :  { %18 = dma.hbm_to_vmem [thread:$0]  %s1587_s0, 4096, %s13_s7, [#allocation5], %s843_s9, %s843_s9, %s844_s10  }
   0xc   :  { %840 = dma.done.wait [#allocation5], 4096  }
   0xd   :  { %841 = vsyncadd [#allocation5], 4294963200  ;;  %vm26_vm0 = vcmask 7168   ;;  %v845_v0 = vmov -3.4028235e+38   ;;  %v869_v1 = vld [vmem:[#allocation4] sm:$0xff] }
   0xe   :  { %27 = vst.msk [vmem:[#allocation2] sm:$0xff] %vm26_vm0, %v845_v0  ;;  %28 = vst.msk [vmem:[#allocation2 + $0x8] sm:$0xff] %vm26_vm0, %v845_v0  ;;  %v871_v2 = vld [vmem:[#allocation4 + $0x8] sm:$0xff]  ;;  %v873_v3 = vld [vmem:[#allocation4 + $0x10] sm:$0xff]  ;;  %v75_v4 = vunpack.c.l.bf16 %v869_v1  ;;  %v76_v5 = vunpack.c.h.bf16 %v869_v1 }
   0xf   :  { %29 = vst.msk [vmem:[#allocation2 + $0x10] sm:$0xff] %vm26_vm0, %v845_v0  ;;  %30 = vst.msk [vmem:[#allocation2 + $0x18] sm:$0xff] %vm26_vm0, %v845_v0  ;;  %v77_v6 = vunpack.c.l.bf16 %v871_v2  ;;  %v878_v7 = vld [vmem:[#allocation4 + $0x20] sm:$0xff]  ;;  %v880_v8 = vld [vmem:[#allocation4 + $0x28] sm:$0xff]  ;;  %v78_v9 = vunpack.c.h.bf16 %v871_v2  ;;  %v79_v17 = vunpack.c.l.bf16 %v873_v3  ;;  %v1594_v18 = vunpack.c.h.bf16 %v873_v3 }
  0x10   :  { %31 = vst.msk [vmem:[#allocation2 + $0x20] sm:$0xff] %vm26_vm0, %v845_v0  ;;  %32 = vst.msk [vmem:[#allocation2 + $0x28] sm:$0xff] %vm26_vm0, %v845_v0  ;;  %v883_v10 = vld [vmem:[#allocation4 + $0x40] sm:$0xff]  ;;  %v885_v11 = vld [vmem:[#allocation4 + $0x18] sm:$0xff]  ;;  %v147_v12 = vmax.f32 %v75_v4, %v76_v5  ;;  %v83_v13 = vunpack.c.l.bf16 %v878_v7  ;;  %v1646_v14 = vunpack.c.h.bf16 %v878_v7  ;;  %v1645_v15 = vunpack.c.l.bf16 %v880_v8 }
  0x11   :  { %33 = vst.msk [vmem:[#allocation2 + $0x30] sm:$0xff] %vm26_vm0, %v845_v0  ;;  %34 = vst.msk [vmem:[#allocation2 + $0x38] sm:$0xff] %vm26_vm0, %v845_v0  ;;  %v894_v16 = vld [vmem:[#allocation4 + $0x48] sm:$0xff]  ;;  %v898_v19 = vld [vmem:[#allocation4 + $0x30] sm:$0xff]  ;;  %v1644_v21 = vunpack.c.h.bf16 %v880_v8  ;;  %v1642_v23 = vunpack.c.l.bf16 %v883_v10  ;;  %v1593_v25 = vunpack.c.l.bf16 %v885_v11  ;;  %v1592_v26 = vunpack.c.h.bf16 %v885_v11 }
  0x12   :  { %v148_v20 = vmax.f32 %v147_v12, %v77_v6  ;;  %v156_v22 = vmax.f32 %v83_v13, %v1646_v14  ;;  %v908_v24 = vld [vmem:[#allocation4 + $0x60] sm:$0xff]  ;;  %v912_v27 = vld [vmem:[#allocation4 + $0x38] sm:$0xff]  ;;  %v1641_v28 = vunpack.c.h.bf16 %v883_v10  ;;  %v1623_v29 = vunpack.c.l.bf16 %v894_v16  ;;  %v916_v30 = vld [vmem:[#allocation4 + $0x68] sm:$0xff] }
  0x13   :  { %v1643_v32 = vunpack.c.l.bf16 %v898_v19  ;;  %v1589_v33 = vunpack.c.h.bf16 %v898_v19  ;;  %v924_v35 = vld [vmem:[#allocation4 + $0x50] sm:$0xff]  ;;  %v1619_v36 = vunpack.c.h.bf16 %v894_v16  ;;  %v1612_v38 = vunpack.c.l.bf16 %v908_v24  ;;  %v938_v43 = vld [vmem:[#allocation4 + $0x58] sm:$0xff]  ;;  %v941_v45 = vld [vmem:[#allocation4 + $0x80] sm:$0xff] }
  0x14   :  { %v149_v31 = vmax.f32 %v148_v20, %v78_v9  ;;  %v157_v34 = vmax.f32 %v156_v22, %v1645_v15  ;;  %v165_v37 = vmax.f32 %v1642_v23, %v1641_v28  ;;  %v1610_v39 = vunpack.c.h.bf16 %v908_v24  ;;  %v948_v50 = vld [vmem:[#allocation4 + $0x70] sm:$0xff]  ;;  %v959_v55 = vld [vmem:[#allocation4 + $0x88] sm:$0xff]  ;;  %v973_v0 = vld [vmem:[#allocation4 + $0xa0] sm:$0xff] }
  0x15   :  { %v1590_v41 = vunpack.c.l.bf16 %v912_v27  ;;  %v1603_v44 = vunpack.c.l.bf16 %v916_v30  ;;  %v1595_v46 = vunpack.c.h.bf16 %v912_v27  ;;  %v1613_v47 = vunpack.c.l.bf16 %v924_v35  ;;  %v978_v22 = vld [vmem:[#allocation4 + $0x78] sm:$0xff] }
  0x16   :  { %v150_v40 = vmax.f32 %v149_v31, %v79_v17  ;;  %v158_v42 = vmax.f32 %v157_v34, %v1644_v21  ;;  %v1591_v48 = vunpack.c.h.bf16 %v924_v35  ;;  %v166_v49 = vmax.f32 %v165_v37, %v1623_v29  ;;  %v982_v37 = vld [vmem:[#allocation4 + $0xa8] sm:$0xff] }
  0x17   :  { %v1602_v53 = vunpack.c.h.bf16 %v916_v30  ;;  %v174_v54 = vmax.f32 %v1612_v38, %v1610_v39  ;;  %v1598_v56 = vunpack.c.l.bf16 %v938_v43  ;;  %v1597_v58 = vunpack.c.l.bf16 %v941_v45 }
  0x18   :  { %v151_v51 = vmax.f32 %v150_v40, %v1594_v18  ;;  %v159_v52 = vmax.f32 %v158_v42, %v1643_v32  ;;  %v167_v57 = vmax.f32 %v166_v49, %v1619_v36  ;;  %v1596_v59 = vunpack.c.h.bf16 %v941_v45  ;;  %v1080_v36 = vld [vmem:[#allocation4 + $0xf0] sm:$0xff] }
  0x19   :  { %v1600_v62 = vunpack.c.l.bf16 %v948_v50  ;;  %v175_v63 = vmax.f32 %v174_v54, %v1603_v44  ;;  %v1605_v12 = vunpack.c.h.bf16 %v938_v43  ;;  %v1601_v31 = vunpack.c.h.bf16 %v948_v50 }
  0x1a   :  { %v152_v60 = vmax.f32 %v151_v51, %v1593_v25  ;;  %v160_v61 = vmax.f32 %v159_v52, %v1589_v33  ;;  %v168_v20 = vmax.f32 %v167_v57, %v1613_v47  ;;  %v1599_v34 = vunpack.c.l.bf16 %v959_v55  ;;  %v990_v51 = vld [vmem:[#allocation4 + $0x90] sm:$0xff] }
  0x1b   :  { %v176_v49 = vmax.f32 %v175_v63, %v1602_v53  ;;  %v1608_v52 = vunpack.c.h.bf16 %v959_v55  ;;  %v183_v57 = vmax.f32 %v1597_v58, %v1596_v59  ;;  %v1604_v33 = vunpack.c.h.bf16 %v973_v0  ;;  %v1021_v59 = vld [vmem:[#allocation4 + $0x98] sm:$0xff] }
  0x1c   :  { %v153_v40 = vmax.f32 %v152_v60, %v1592_v26  ;;  %v161_v42 = vmax.f32 %v160_v61, %v1590_v41  ;;  %v169_v54 = vmax.f32 %v168_v20, %v1591_v48  ;;  %v1606_v60 = vunpack.c.l.bf16 %v973_v0  ;;  %v1007_v48 = vld [vmem:[#allocation4 + $0xc0] sm:$0xff]  ;;  %v1037_v53 = vld [vmem:[#allocation4 + $0xb8] sm:$0xff] }
  0x1d   :  { %v1607_v63 = vunpack.c.l.bf16 %v978_v22  ;;  %v177_v41 = vmax.f32 %v176_v49, %v1600_v62  ;;  %v1609_v20 = vunpack.c.l.bf16 %v982_v37  ;;  %v1614_v25 = vunpack.c.h.bf16 %v978_v22 }
  0x1e   :  { %154 = vmax.xlane.f32.xlu0 %v153_v40  ;;  %v162_v61 = vmax.f32 %v161_v42, %v1595_v46  ;;  %v170_v26 = vmax.f32 %v169_v54, %v1598_v56  ;;  %v1611_v18 = vunpack.c.l.bf16 %v990_v51  ;;  %v184_v40 = vmax.f32 %v183_v57, %v1599_v34  ;;  %v1015_v42 = vld [vmem:[#allocation4 + $0xb0] sm:$0xff]  ;;  %v1017_v46 = vld [vmem:[#allocation4 + $0xc8] sm:$0xff] }
  0x1f   :  { %v178_v49 = vmax.f32 %v177_v41, %v1601_v31  ;;  %v1617_v58 = vunpack.c.h.bf16 %v990_v51  ;;  %v1615_v54 = vunpack.c.h.bf16 %v982_v37  ;;  %v192_v56 = vmax.f32 %v1606_v60, %v1604_v33 }
  0x20   :  { %v171_v57 = vmax.f32 %v170_v26, %v1605_v12  ;;  %v185_v34 = vmax.f32 %v184_v40, %v1608_v52  ;;  %v1618_v62 = vunpack.c.l.bf16 %v1007_v48  ;;  %v1616_v41 = vunpack.c.h.bf16 %v1007_v48  ;;  %v1043_v12 = vld [vmem:[#allocation4 + $0xe0] sm:$0xff]  ;;  %v1052_v52 = vld [vmem:[#allocation4 + $0xe8] sm:$0xff] }
  0x21   :  { %v179_v31 = vmax.f32 %v178_v49, %v1607_v63  ;;  %v1620_v44 = vunpack.c.l.bf16 %v1015_v42  ;;  %v193_v33 = vmax.f32 %v192_v56, %v1609_v20  ;;  %v1622_v26 = vunpack.c.l.bf16 %v1017_v46  ;;  %v1050_v63 = vld [vmem:[#allocation4 + $0xd0] sm:$0xff] }
  0x22   :  { %163 = vmax.xlane.f32.xlu0 %v162_v61  ;;  %172 = vmax.xlane.f32.xlu1 %v171_v57  ;;  %v1621_v40 = vunpack.c.l.bf16 %v1021_v59  ;;  %v1626_v60 = vunpack.c.h.bf16 %v1021_v59  ;;  %v186_v61 = vmax.f32 %v185_v34, %v1611_v18  ;;  %v1624_v49 = vunpack.c.h.bf16 %v1015_v42 }
  0x23   :  { %v180_v56 = vmax.f32 %v179_v31, %v1614_v25  ;;  %v194_v20 = vmax.f32 %v193_v33, %v1615_v54  ;;  %v1640_v57 = vunpack.c.h.bf16 %v1017_v46  ;;  %v201_v39 = vmax.f32 %v1618_v62, %v1616_v41  ;;  %v1070_v33 = vld [vmem:[#allocation4 + $0xd8] sm:$0xff] }
  0x24   :  { %v187_v34 = vmax.f32 %v186_v61, %v1617_v58  ;;  %v1627_v18 = vunpack.c.l.bf16 %v1037_v53  ;;  %v1638_v38 = vunpack.c.l.bf16 %v1043_v12  ;;  %v1625_v47 = vunpack.c.h.bf16 %v1043_v12 }
  0x25   :  { %v195_v31 = vmax.f32 %v194_v20, %v1620_v44  ;;  %v1639_v25 = vunpack.c.l.bf16 %v1050_v63  ;;  %v202_v54 = vmax.f32 %v201_v39, %v1622_v26  ;;  %v1637_v41 = vunpack.c.l.bf16 %v1052_v52 }
  0x26   :  { %181 = vmax.xlane.f32.xlu1 %v180_v56  ;;  %v188_v61 = vmax.f32 %v187_v34, %v1621_v40  ;;  %v1628_v58 = vunpack.c.h.bf16 %v1037_v53  ;;  %v1634_v62 = vunpack.c.h.bf16 %v1050_v63  ;;  %v1636_v20 = vunpack.c.h.bf16 %v1052_v52 }
  0x27   :  { %v196_v44 = vmax.f32 %v195_v31, %v1624_v49  ;;  %v203_v39 = vmax.f32 %v202_v54, %v1640_v57  ;;  %v210_v56 = vmax.f32 %v1638_v38, %v1625_v47  ;;  %v1632_v40 = vunpack.c.l.bf16 %v1070_v33  ;;  %v1197_v38 = vld [vmem:[#allocation2 + $0x38] sm:$0xff] }
  0x28   :  { %v189_v34 = vmax.f32 %v188_v61, %v1626_v60  ;;  %v846_v26 = vmov 0   ;;  %v1635_v54 = vunpack.c.l.bf16 %v1080_v36  ;;  %v1631_v47 = vunpack.c.h.bf16 %v1070_v33  ;;  %v1102_v61 = vld [vmem:[#allocation4 + $0xf8] sm:$0xff]  ;;  %1677 = vst [vmem:[#allocation21_spill] sm:$0xff] %v1197_v38 }
  0x29   :  { %658 = vset.pattern.permute.xlu0 %v846_v26  ;;  %659 = vset.pattern.permute.xlu1 %v846_v26  ;;  %v197_v29 = vmax.f32 %v196_v44, %v1627_v18  ;;  %v204_v31 = vmax.f32 %v203_v39, %v1639_v25  ;;  %v211_v49 = vmax.f32 %v210_v56, %v1637_v41  ;;  %v1633_v44 = vunpack.c.h.bf16 %v1080_v36 }
  0x2a   :  { %190 = vmax.xlane.f32.xlu0 %v189_v34  ;;  %v1630_v34 = vunpack.c.l.bf16 %v1102_v61  ;;  %v1680_v2 = vunpack.c.l.bf16 %v880_v8 }
  0x2b   :  { %v198_v60 = vmax.f32 %v197_v29, %v1628_v58  ;;  %v205_v26 = vmax.f32 %v204_v31, %v1634_v62  ;;  %v212_v39 = vmax.f32 %v211_v49, %v1636_v20  ;;  %v1629_v58 = vunpack.c.h.bf16 %v1102_v61  ;;  %v1177_v62 = vld [vmem:[#allocation2 + $0x28] sm:$0xff]  ;;  %v1187_v20 = vld [vmem:[#allocation2 + $0x30] sm:$0xff] }
  0x2c   :  { %1673 = vst [vmem:[#allocation17_spill] sm:$0xff] %v1177_v62  ;;  %1675 = vst [vmem:[#allocation19_spill] sm:$0xff] %v1187_v20 }
  0x2d   :  { %199 = vmax.xlane.f32.xlu1 %v198_v60  ;;  %v206_v56 = vmax.f32 %v205_v26, %v1632_v40  ;;  %v213_v18 = vmax.f32 %v212_v39, %v1635_v54  ;;  %v847_v26 = vmov 0.0  }
  0x2e   :  { %35 = vst.msk [vmem:[#allocation3] sm:$0xff] %vm26_vm0, %v847_v26  ;;  %36 = vst.msk [vmem:[#allocation3 + $0x8] sm:$0xff] %vm26_vm0, %v847_v26 }
  0x2f   :  { %v207_v29 = vmax.f32 %v206_v56, %v1631_v47  ;;  %v214_v31 = vmax.f32 %v213_v18, %v1633_v44  ;;  %37 = vst.msk [vmem:[#allocation3 + $0x10] sm:$0xff] %vm26_vm0, %v847_v26  ;;  %38 = vst.msk [vmem:[#allocation3 + $0x18] sm:$0xff] %vm26_vm0, %v847_v26  ;;  %v1133_v18 = vld [vmem:[#allocation2] sm:$0xff] }
  0x30   :  { %39 = vst.msk [vmem:[#allocation3 + $0x20] sm:$0xff] %vm26_vm0, %v847_v26  ;;  %40 = vst.msk [vmem:[#allocation3 + $0x28] sm:$0xff] %vm26_vm0, %v847_v26 }
  0x31   :  { %208 = vmax.xlane.f32.xlu0 %v207_v29  ;;  %v215_v60 = vmax.f32 %v214_v31, %v1630_v34  ;;  %41 = vst.msk [vmem:[#allocation3 + $0x30] sm:$0xff] %vm26_vm0, %v847_v26  ;;  %42 = vst.msk [vmem:[#allocation3 + $0x38] sm:$0xff] %vm26_vm0, %v847_v26  ;;  %v1138_v29 = vld [vmem:[#allocation2 + $0x8] sm:$0xff]  ;;  %v1158_v31 = vld [vmem:[#allocation2 + $0x18] sm:$0xff] }
  0x32   :  { %1663 = vst [vmem:[#allocation7_spill] sm:$0xff] %v1133_v18  ;;  %1665 = vst [vmem:[#allocation9_spill] sm:$0xff] %v1138_v29  ;;  %v1168_v34 = vld [vmem:[#allocation2 + $0x20] sm:$0xff] }
  0x33   :  { %v216_v49 = vmax.f32 %v215_v60, %v1629_v58  ;;  %v1145_v60 = vld [vmem:[#allocation2 + $0x10] sm:$0xff]  ;;  %1669 = vst [vmem:[#allocation13_spill] sm:$0xff] %v1158_v31  ;;  %1671 = vst [vmem:[#allocation15_spill] sm:$0xff] %v1168_v34 }
  0x34   :  { %1666 = vst [vmem:[#allocation10_spill] sm:$0xff] %v1145_v60 }
  0x35   :  { %217 = vmax.xlane.f32.xlu1 %v216_v49 }
  0xa7   :  { %v155_v39 = vpop.xlane.xlu0 %154 }
  0xa8   :  { %v1136_v56 = vmax.f32 %v1133_v18, %v155_v39 }
  0xaa   :  { %1664 = vst [vmem:[#allocation8_spill] sm:$0xff] %v1136_v56  ;;  %588 = vst.msk [vmem:[#allocation2] sm:$0xff] %vm26_vm0, %v1136_v56  ;;  %269 = vperm.xlu0 %658, %v1136_v56  }
  0xab   :  { %v164_v49 = vpop.xlane.xlu0 %163  ;;  %v173_v58 = vpop.xlane.xlu1 %172 }
  0xac   :  { %v1148_v26 = vmax.f32 %v1138_v29, %v164_v49  ;;  %v1151_v39 = vmax.f32 %v1145_v60, %v173_v58 }
  0xae   :  { %1667 = vst [vmem:[#allocation11_spill] sm:$0xff] %v1148_v26  ;;  %1668 = vst [vmem:[#allocation12_spill] sm:$0xff] %v1151_v39  ;;  %274 = vperm.xlu1 %659, %v1148_v26  }
  0xaf   :  { %589 = vst.msk [vmem:[#allocation2 + $0x8] sm:$0xff] %vm26_vm0, %v1148_v26  ;;  %590 = vst.msk [vmem:[#allocation2 + $0x10] sm:$0xff] %vm26_vm0, %v1151_v39  ;;  %v182_v49 = vpop.xlane.xlu1 %181 }
  0xb0   :  { %v1165_v58 = vmax.f32 %v1158_v31, %v182_v49 }
  0xb2   :  { %1670 = vst [vmem:[#allocation14_spill] sm:$0xff] %v1165_v58  ;;  %279 = vperm.xlu1 %659, %v1151_v39   ;;  %591 = vst.msk [vmem:[#allocation2 + $0x18] sm:$0xff] %vm26_vm0, %v1165_v58 }
  0xb3   :  { %v191_v44 = vpop.xlane.xlu0 %190 }
  0xb4   :  { %v1175_v47 = vmax.f32 %v1168_v34, %v191_v44 }
  0xb6   :  { %1672 = vst [vmem:[#allocation16_spill] sm:$0xff] %v1175_v47  ;;  %284 = vperm.xlu1 %659, %v1165_v58   ;;  %592 = vst.msk [vmem:[#allocation2 + $0x20] sm:$0xff] %vm26_vm0, %v1175_v47  ;;  %v200_v54 = vpop.xlane.xlu1 %199 }
  0xb7   :  { %v1185_v40 = vmax.f32 %v1177_v62, %v200_v54 }
  0xb9   :  { %1674 = vst [vmem:[#allocation18_spill] sm:$0xff] %v1185_v40  ;;  %593 = vst.msk [vmem:[#allocation2 + $0x28] sm:$0xff] %vm26_vm0, %v1185_v40 }
  0xba   :  { %289 = vperm.xlu1 %659, %v1175_v47   ;;  %v209_v41 = vpop.xlane.xlu0 %208 }
  0xbb   :  { %v1195_v49 = vmax.f32 %v1187_v20, %v209_v41 }
  0xbd   :  { %1676 = vst [vmem:[#allocation20_spill] sm:$0xff] %v1195_v49  ;;  %594 = vst.msk [vmem:[#allocation2 + $0x30] sm:$0xff] %vm26_vm0, %v1195_v49 }
  0xbe   :  { %294 = vperm.xlu1 %659, %v1185_v40   ;;  %v218_v25 = vpop.xlane.xlu1 %217 }
  0xbf   :  { %v1205_v44 = vmax.f32 %v1197_v38, %v218_v25 }
  0xc1   :  { %1678 = vst [vmem:[#allocation22_spill] sm:$0xff] %v1205_v44  ;;  %595 = vst.msk [vmem:[#allocation2 + $0x38] sm:$0xff] %vm26_vm0, %v1205_v44 }
  0xc2   :  { %299 = vperm.xlu1 %659, %v1195_v49  }
  0xc6   :  { %304 = vperm.xlu1 %659, %v1205_v44  }
 0x125   :  { %v1213_v57 = vpop.permute.xlu0 %269 }
 0x126   :  { %v307_v54 = vsub.f32 %v75_v4, %v1213_v57  ;;  %v308_v25 = vsub.f32 %v76_v5, %v1213_v57  ;;  %v309_v28 = vsub.f32 %v77_v6, %v1213_v57  ;;  %v310_v41 = vsub.f32 %v78_v9, %v1213_v57 }
 0x127   :  { %v311_v23 = vsub.f32 %v79_v17, %v1213_v57  ;;  %v1679_v5 = vunpack.c.h.bf16 %v878_v7 }
 0x128   :  { %v371_v32 = vmul.f32 1.442695, %v307_v54  ;;  %v373_v21 = vmul.f32 1.442695, %v308_v25  ;;  %v375_v15 = vmul.f32 1.442695, %v309_v28  ;;  %v1681_v28 = vunpack.c.h.bf16 %v880_v8 }
 0x129   :  { %v1230_v4 = vpop.permute.xlu1 %274  ;;  %v377_v14 = vmul.f32 1.442695, %v310_v41  ;;  %v379_v17 = vmul.f32 1.442695, %v311_v23  ;;  %v1682_v41 = vunpack.c.l.bf16 %v898_v19  ;;  %v1684_v8 = vunpack.c.h.bf16 %v883_v10 }
 0x12a   :  { %v315_v1 = vsub.f32 %v83_v13, %v1230_v4  ;;  %v316_v6 = vsub.f32 %v1679_v5, %v1230_v4  ;;  %v317_v9 = vsub.f32 %v1680_v2, %v1230_v4  ;;  %660 = vpow2.f32 %v371_v32 }
 0x12b   :  { %v318_v54 = vsub.f32 %v1681_v28, %v1230_v4  ;;  %662 = vpow2.f32 %v373_v21  ;;  %v319_v25 = vsub.f32 %v1682_v41, %v1230_v4  ;;  %v1683_v32 = vunpack.c.l.bf16 %v883_v10 }
 0x12c   :  { %v387_v13 = vmul.f32 1.442695, %v315_v1  ;;  %664 = vpow2.f32 %v375_v15  ;;  %v389_v44 = vmul.f32 1.442695, %v316_v6  ;;  %v391_v5 = vmul.f32 1.442695, %v317_v9 }
 0x12d   :  { %v1247_v7 = vpop.permute.xlu1 %279  ;;  %666 = vpow2.f32 %v377_v14  ;;  %v393_v21 = vmul.f32 1.442695, %v318_v54  ;;  %v1685_v28 = vunpack.c.l.bf16 %v894_v16  ;;  %v395_v15 = vmul.f32 1.442695, %v319_v25 }
 0x12e   :  { %v323_v23 = vsub.f32 %v1683_v32, %v1247_v7  ;;  %v324_v2 = vsub.f32 %v1684_v8, %v1247_v7  ;;  %668 = vpow2.f32 %v379_v17  ;;  %v1686_v14 = vunpack.c.h.bf16 %v894_v16 }
 0x12f   :  { %v325_v1 = vsub.f32 %v1685_v28, %v1247_v7  ;;  %670 = vpow2.f32 %v387_v13  ;;  %v1687_v9 = vunpack.c.l.bf16 %v924_v35  ;;  %v1688_v54 = vunpack.c.l.bf16 %v908_v24 }
 0x130   :  { %v326_v6 = vsub.f32 %v1686_v14, %v1247_v7  ;;  %672 = vpow2.f32 %v389_v44  ;;  %v403_v32 = vmul.f32 1.442695, %v323_v23  ;;  %v405_v17 = vmul.f32 1.442695, %v324_v2 }
 0x131   :  { %v327_v41 = vsub.f32 %v1687_v9, %v1247_v7  ;;  %v1264_v10 = vpop.permute.xlu1 %284  ;;  %674 = vpow2.f32 %v391_v5  ;;  %v407_v25 = vmul.f32 1.442695, %v325_v1  ;;  %v1689_v16 = vunpack.c.h.bf16 %v908_v24 }
 0x132   :  { %v331_v8 = vsub.f32 %v1688_v54, %v1264_v10  ;;  %676 = vpow2.f32 %v393_v21  ;;  %v409_v44 = vmul.f32 1.442695, %v326_v6  ;;  %v1690_v28 = vunpack.c.l.bf16 %v916_v30 }
 0x133   :  { %v332_v13 = vsub.f32 %v1689_v16, %v1264_v10  ;;  %678 = vpow2.f32 %v395_v15  ;;  %v411_v14 = vmul.f32 1.442695, %v327_v41  ;;  %v1691_v5 = vunpack.c.h.bf16 %v916_v30 }
 0x134   :  { %v333_v23 = vsub.f32 %v1690_v28, %v1264_v10  ;;  %680 = vpow2.f32 %v403_v32  ;;  %v1692_v21 = vunpack.c.l.bf16 %v948_v50  ;;  %v419_v1 = vmul.f32 1.442695, %v331_v8 }
 0x135   :  { %v334_v2 = vsub.f32 %v1691_v5, %v1264_v10  ;;  %v1278_v9 = vpop.permute.xlu1 %289  ;;  %682 = vpow2.f32 %v405_v17  ;;  %v421_v15 = vmul.f32 1.442695, %v332_v13  ;;  %v1693_v6 = vunpack.c.l.bf16 %v941_v45 }
 0x136   :  { %v335_v24 = vsub.f32 %v1692_v21, %v1264_v10  ;;  %684 = vpow2.f32 %v407_v25  ;;  %v423_v41 = vmul.f32 1.442695, %v333_v23  ;;  %v1694_v30 = vunpack.c.h.bf16 %v941_v45 }
 0x137   :  { %v339_v54 = vsub.f32 %v1693_v6, %v1278_v9  ;;  %v1286_v32 = vpop.eup %660  ;;  %686 = vpow2.f32 %v409_v44  ;;  %v425_v28 = vmul.f32 1.442695, %v334_v2  ;;  %v1695_v8 = vunpack.c.l.bf16 %v959_v55 }
 0x138   :  { %v340_v16 = vsub.f32 %v1694_v30, %v1278_v9  ;;  %v1291_v17 = vpop.eup %662  ;;  %688 = vpow2.f32 %v411_v14  ;;  %v427_v21 = vmul.f32 1.442695, %v335_v24  ;;  %v1696_v44 = vunpack.c.h.bf16 %v959_v55 }
 0x139   :  { %v341_v25 = vsub.f32 %v1695_v8, %v1278_v9  ;;  %v1296_v13 = vpop.permute.xlu1 %294  ;;  %v1298_v5 = vpop.eup %664  ;;  %690 = vpow2.f32 %v419_v1  ;;  %v1697_v14 = vunpack.c.l.bf16 %v990_v51  ;;  %v435_v6 = vmul.f32 1.442695, %v339_v54 }
 0x13a   :  { %v342_v23 = vsub.f32 %v1696_v44, %v1278_v9  ;;  %v1303_v45 = vpop.eup %666  ;;  %692 = vpow2.f32 %v421_v15  ;;  %v437_v8 = vmul.f32 1.442695, %v340_v16  ;;  %v1698_v1 = vunpack.c.l.bf16 %v973_v0 }
 0x13b   :  { %v343_v2 = vsub.f32 %v1697_v14, %v1278_v9  ;;  %v1308_v30 = vpop.eup %668  ;;  %694 = vpow2.f32 %v423_v41  ;;  %v439_v55 = vmul.f32 1.442695, %v341_v25  ;;  %v1699_v15 = vunpack.c.h.bf16 %v973_v0 }
 0x13c   :  { %v347_v24 = vsub.f32 %v1698_v1, %v1296_v13  ;;  %v1313_v38 = vpop.eup %670  ;;  %696 = vpow2.f32 %v425_v28  ;;  %v441_v54 = vmul.f32 1.442695, %v342_v23  ;;  %v1700_v41 = vunpack.c.l.bf16 %v982_v37 }
 0x13d   :  { %v348_v44 = vsub.f32 %v1699_v15, %v1296_v13  ;;  %v1318_v49 = vpop.permute.xlu1 %299  ;;  %v1320_v14 = vpop.eup %672  ;;  %698 = vpow2.f32 %v427_v21  ;;  %v443_v1 = vmul.f32 1.442695, %v343_v2  ;;  %v1701_v28 = vunpack.c.h.bf16 %v982_v37 }
 0x13e   :  { %v349_v16 = vsub.f32 %v1700_v41, %v1296_v13  ;;  %v1325_v20 = vpop.eup %674  ;;  %700 = vpow2.f32 %v435_v6  ;;  %v1702_v15 = vunpack.c.l.bf16 %v1015_v42  ;;  %v451_v23 = vmul.f32 1.442695, %v347_v24 }
 0x13f   :  { %v350_v25 = vsub.f32 %v1701_v28, %v1296_v13  ;;  %v1330_v0 = vpop.eup %676  ;;  %702 = vpow2.f32 %v437_v8  ;;  %v453_v41 = vmul.f32 1.442695, %v348_v44  ;;  %v1703_v6 = vunpack.c.l.bf16 %v1007_v48 }
 0x140   :  { %v351_v21 = vsub.f32 %v1702_v15, %v1296_v13  ;;  %v1335_v40 = vpop.eup %678  ;;  %704 = vpow2.f32 %v439_v55  ;;  %v455_v37 = vmul.f32 1.442695, %v349_v16  ;;  %v1704_v8 = vunpack.c.h.bf16 %v1007_v48 }
 0x141   :  { %v355_v2 = vsub.f32 %v1703_v6, %v1318_v49  ;;  %v1340_v62 = vpop.eup %680  ;;  %706 = vpow2.f32 %v441_v54  ;;  %v457_v24 = vmul.f32 1.442695, %v350_v25  ;;  %v1705_v55 = vunpack.c.l.bf16 %v1017_v46  ;;  %v1350_v15 = vpop.permute.xlu1 %304 }
 0x142   :  { %v356_v28 = vsub.f32 %v1704_v8, %v1318_v49  ;;  %v1345_v47 = vpop.eup %682  ;;  %708 = vpow2.f32 %v443_v1  ;;  %v459_v6 = vmul.f32 1.442695, %v351_v21  ;;  %v1706_v54 = vunpack.c.h.bf16 %v1017_v46 }
 0x143   :  { %v357_v44 = vsub.f32 %v1705_v55, %v1318_v49  ;;  %v1352_v34 = vpop.eup %684  ;;  %710 = vpow2.f32 %v451_v23  ;;  %v1707_v1 = vunpack.c.l.bf16 %v1050_v63  ;;  %v467_v8 = vmul.f32 1.442695, %v355_v2 }
 0x144   :  { %v358_v16 = vsub.f32 %v1706_v54, %v1318_v49  ;;  %v1357_v48 = vpop.eup %686  ;;  %712 = vpow2.f32 %v453_v41  ;;  %v469_v55 = vmul.f32 1.442695, %v356_v28  ;;  %v1708_v23 = vunpack.c.l.bf16 %v1043_v12 }
 0x145   :  { %v359_v25 = vsub.f32 %v1707_v1, %v1318_v49  ;;  %v1362_v58 = vpop.eup %688  ;;  %714 = vpow2.f32 %v455_v37  ;;  %v471_v46 = vmul.f32 1.442695, %v357_v44  ;;  %v1709_v54 = vunpack.c.h.bf16 %v1043_v12 }
 0x146   :  { %v363_v21 = vsub.f32 %v1708_v23, %v1350_v15  ;;  %v691_v31 = vpop.eup %690  ;;  %716 = vpow2.f32 %v457_v24  ;;  %v473_v60 = vmul.f32 1.442695, %v358_v16  ;;  %v1710_v2 = vunpack.c.l.bf16 %v1052_v52 }
 0x147   :  { %v364_v41 = vsub.f32 %v1709_v54, %v1350_v15  ;;  %v693_v39 = vpop.eup %692  ;;  %718 = vpow2.f32 %v459_v6  ;;  %v475_v28 = vmul.f32 1.442695, %v359_v25  ;;  %v1711_v23 = vunpack.c.h.bf16 %v1052_v52 }
 0x148   :  { %v365_v1 = vsub.f32 %v1710_v2, %v1350_v15  ;;  %v1373_v37 = vpop.eup %694  ;;  %720 = vpow2.f32 %v467_v8  ;;  %v1712_v12 = vunpack.c.h.bf16 %v873_v3  ;;  %v483_v6 = vmul.f32 1.442695, %v363_v21 }
 0x149   :  { %v366_v24 = vsub.f32 %v1711_v23, %v1350_v15  ;;  %v1378_v44 = vpop.eup %696  ;;  %722 = vpow2.f32 %v469_v55  ;;  %v1713_v16 = vunpack.c.l.bf16 %v885_v11  ;;  %v1714_v25 = vunpack.c.l.bf16 %v1080_v36 }
 0x14a   :  { %v312_v54 = vsub.f32 %v1712_v12, %v1213_v57  ;;  %v1386_v26 = vpop.eup %698  ;;  %724 = vpow2.f32 %v471_v46  ;;  %v485_v8 = vmul.f32 1.442695, %v364_v41  ;;  %v487_v29 = vmul.f32 1.442695, %v365_v1 }
 0x14b   :  { %v313_v2 = vsub.f32 %v1713_v16, %v1213_v57  ;;  %v367_v52 = vsub.f32 %v1714_v25, %v1350_v15  ;;  %v1391_v23 = vpop.eup %700  ;;  %726 = vpow2.f32 %v473_v60  ;;  %v1715_v3 = vunpack.c.h.bf16 %v885_v11 }
 0x14c   :  { %v1396_v21 = vpop.eup %702  ;;  %v1716_v12 = vunpack.c.h.bf16 %v898_v19  ;;  %728 = vpow2.f32 %v475_v28  ;;  %v489_v46 = vmul.f32 1.442695, %v366_v24  ;;  %v1717_v41 = vunpack.c.h.bf16 %v924_v35 }
 0x14d   :  { %v314_v55 = vsub.f32 %v1715_v3, %v1213_v57  ;;  %v1401_v56 = vpop.eup %704  ;;  %730 = vpow2.f32 %v483_v6  ;;  %v381_v60 = vmul.f32 1.442695, %v312_v54  ;;  %v383_v1 = vmul.f32 1.442695, %v313_v2 }
 0x14e   :  { %v320_v16 = vsub.f32 %v1716_v12, %v1230_v4  ;;  %v328_v25 = vsub.f32 %v1717_v41, %v1247_v7  ;;  %v1406_v18 = vpop.eup %706  ;;  %732 = vpow2.f32 %v485_v8  ;;  %v491_v11 = vmul.f32 1.442695, %v367_v52 }
 0x14f   :  { %v499_v57 = vadd.f32 %v1291_v17, %v1286_v32  ;;  %v1718_v19 = vunpack.c.l.bf16 %v912_v27  ;;  %v1413_v24 = vpop.eup %708  ;;  %v1719_v35 = vunpack.c.h.bf16 %v948_v50  ;;  %734 = vpow2.f32 %v487_v29 }
 0x150   :  { %v385_v54 = vmul.f32 1.442695, %v314_v55  ;;  %v508_v6 = vadd.f32 %v1320_v14, %v1313_v38  ;;  %v1420_v2 = vpop.eup %710  ;;  %736 = vpow2.f32 %v489_v46  ;;  %v1720_v32 = vunpack.c.h.bf16 %v912_v27 }
 0x151   :  { %v321_v28 = vsub.f32 %v1718_v19, %v1230_v4  ;;  %v336_v3 = vsub.f32 %v1719_v35, %v1264_v10  ;;  %v397_v52 = vmul.f32 1.442695, %v320_v16  ;;  %v517_v8 = vadd.f32 %v1345_v47, %v1340_v62  ;;  %v713_v12 = vpop.eup %712 }
 0x152   :  { %v322_v17 = vsub.f32 %v1720_v32, %v1230_v4  ;;  %v1721_v50 = vunpack.c.h.bf16 %v990_v51  ;;  %v1722_v55 = vunpack.c.h.bf16 %v1015_v42  ;;  %738 = vpow2.f32 %v381_v60  ;;  %v1436_v27 = vpop.eup %714 }
 0x153   :  { %v1723_v14 = vunpack.c.l.bf16 %v938_v43  ;;  %740 = vpow2.f32 %v491_v11  ;;  %v500_v4 = vadd.f32 %v1298_v5, %v499_v57  ;;  %v399_v47 = vmul.f32 1.442695, %v321_v28  ;;  %v1439_v16 = vpop.eup %716 }
 0x154   :  { %v344_v29 = vsub.f32 %v1721_v50, %v1278_v9  ;;  %v352_v38 = vsub.f32 %v1722_v55, %v1296_v13  ;;  %v526_v62 = vadd.f32 %v693_v39, %v691_v31  ;;  %742 = vpow2.f32 %v383_v1  ;;  %v1445_v19 = vpop.eup %718 }
 0x155   :  { %v329_v46 = vsub.f32 %v1723_v14, %v1247_v7  ;;  %v509_v51 = vadd.f32 %v1325_v20, %v508_v6  ;;  %v1724_v42 = vunpack.c.h.bf16 %v938_v43  ;;  %v413_v60 = vmul.f32 1.442695, %v328_v25  ;;  %v1451_v39 = vpop.eup %720 }
 0x156   :  { %744 = vpow2.f32 %v397_v52  ;;  %v401_v35 = vmul.f32 1.442695, %v322_v17  ;;  %v518_v11 = vadd.f32 %v1352_v34, %v517_v8  ;;  %v1725_v5 = vunpack.c.l.bf16 %v978_v22  ;;  %v723_v57 = vpop.eup %722 }
 0x157   :  { %v330_v41 = vsub.f32 %v1724_v42, %v1247_v7  ;;  %v1726_v20 = vunpack.c.h.bf16 %v1050_v63  ;;  %746 = vpow2.f32 %v385_v54  ;;  %v415_v43 = vmul.f32 1.442695, %v329_v46  ;;  %v1461_v32 = vpop.eup %724 }
 0x158   :  { %v337_v31 = vsub.f32 %v1725_v5, %v1264_v10  ;;  %v1727_v7 = vunpack.c.h.bf16 %v978_v22  ;;  %v501_v28 = vadd.f32 %v1303_v45, %v500_v4  ;;  %748 = vpow2.f32 %v399_v47  ;;  %v1467_v8 = vpop.eup %726 }
 0x159   :  { %v360_v1 = vsub.f32 %v1726_v20, %v1318_v49  ;;  %v429_v34 = vmul.f32 1.442695, %v336_v3  ;;  %v527_v6 = vadd.f32 %v1373_v37, %v526_v62  ;;  %v510_v17 = vadd.f32 %v1330_v0, %v509_v51  ;;  %v1473_v3 = vpop.eup %728 }
 0x15a   :  { %v338_v25 = vsub.f32 %v1727_v7, %v1264_v10  ;;  %750 = vpow2.f32 %v413_v60  ;;  %v417_v63 = vmul.f32 1.442695, %v330_v41  ;;  %v1728_v54 = vunpack.c.l.bf16 %v1021_v59  ;;  %v731_v46 = vpop.eup %730 }
 0x15b   :  { %v1729_v22 = vunpack.c.h.bf16 %v1080_v36  ;;  %752 = vpow2.f32 %v401_v35  ;;  %v519_v45 = vadd.f32 %v1357_v48, %v518_v11  ;;  %v431_v37 = vmul.f32 1.442695, %v337_v31  ;;  %v733_v62 = vpop.eup %732 }
 0x15c   :  { %v345_v52 = vsub.f32 %v1728_v54, %v1278_v9  ;;  %754 = vpow2.f32 %v415_v43  ;;  %v433_v0 = vmul.f32 1.442695, %v338_v25  ;;  %v1730_v50 = vunpack.c.h.bf16 %v1021_v59 }
 0x15d   :  { %v368_v10 = vsub.f32 %v1729_v22, %v1350_v15  ;;  %v445_v14 = vmul.f32 1.442695, %v344_v29  ;;  %756 = vpow2.f32 %v429_v34  ;;  %v528_v4 = vadd.f32 %v1378_v44, %v527_v6 }
 0x15e   :  { %v346_v55 = vsub.f32 %v1730_v50, %v1278_v9  ;;  %v535_v36 = vadd.f32 %v1396_v21, %v1391_v23  ;;  %v1731_v48 = vunpack.c.l.bf16 %v1037_v53  ;;  %v502_v51 = vadd.f32 %v1308_v30, %v501_v28  ;;  %v1486_v9 = vpop.eup %734 }
 0x15f   :  { %v511_v42 = vadd.f32 %v1335_v40, %v510_v17  ;;  %758 = vpow2.f32 %v417_v63  ;;  %v447_v59 = vmul.f32 1.442695, %v345_v52  ;;  %v1732_v44 = vunpack.c.h.bf16 %v1037_v53  ;;  %v1492_v21 = vpop.eup %736 }
 0x160   :  { %v353_v47 = vsub.f32 %v1731_v48, %v1296_v13  ;;  %760 = vpow2.f32 %v431_v37  ;;  %v461_v41 = vmul.f32 1.442695, %v352_v38  ;;  %v544_v23 = vadd.f32 %v713_v12, %v1420_v2  ;;  %v739_v11 = vpop.eup %738 }
 0x161   :  { %v354_v29 = vsub.f32 %v1732_v44, %v1296_v13  ;;  %v520_v60 = vadd.f32 %v1362_v58, %v519_v45  ;;  %762 = vpow2.f32 %v445_v14  ;;  %v449_v30 = vmul.f32 1.442695, %v346_v55  ;;  %v1500_v38 = vpop.eup %740 }
 0x162   :  { %v1733_v40 = vunpack.c.l.bf16 %v1070_v33  ;;  %764 = vpow2.f32 %v433_v0  ;;  %v529_v5 = vadd.f32 %v1386_v26, %v528_v4  ;;  %v536_v53 = vadd.f32 %v1401_v56, %v535_v36  ;;  %v743_v20 = vpop.eup %742 }
 0x163   :  { %v463_v13 = vmul.f32 1.442695, %v353_v47  ;;  %v503_v2 = vadd.f32 %v739_v11, %v502_v51  ;;  %766 = vpow2.f32 %v447_v59  ;;  %v1734_v58 = vunpack.c.h.bf16 %v1070_v33  ;;  %v745_v56 = vpop.eup %744 }
 0x164   :  { %v361_v35 = vsub.f32 %v1733_v40, %v1318_v49  ;;  %v477_v31 = vmul.f32 1.442695, %v360_v1  ;;  %768 = vpow2.f32 %v461_v41  ;;  %v465_v43 = vmul.f32 1.442695, %v354_v29  ;;  %v747_v17 = vpop.eup %746 }
 0x165   :  { %v362_v12 = vsub.f32 %v1734_v58, %v1318_v49  ;;  %v545_v7 = vadd.f32 %v1436_v27, %v544_v23  ;;  %v1735_v26 = vunpack.c.l.bf16 %v1102_v61  ;;  %v504_v28 = vadd.f32 %v743_v20, %v503_v2  ;;  %v749_v54 = vpop.eup %748 }
 0x166   :  { %770 = vpow2.f32 %v449_v30  ;;  %v479_v34 = vmul.f32 1.442695, %v361_v35  ;;  %v553_v6 = vadd.f32 %v723_v57, %v1451_v39  ;;  %v512_v63 = vadd.f32 %v745_v56, %v511_v42 }
 0x167   :  { %v369_v25 = vsub.f32 %v1735_v26, %v1350_v15  ;;  %772 = vpow2.f32 %v463_v13  ;;  %v1736_v33 = vunpack.c.h.bf16 %v1102_v61  ;;  %v493_v1 = vmul.f32 1.442695, %v368_v10  ;;  %v751_v45 = vpop.eup %750 }
 0x168   :  { %v505_v27 = vadd.f32 %v747_v17, %v504_v28  ;;  %v537_v52 = vadd.f32 %v1406_v18, %v536_v53  ;;  %774 = vpow2.f32 %v477_v31  ;;  %v481_v22 = vmul.f32 1.442695, %v362_v12  ;;  %v753_v39 = vpop.eup %752  ;;  %v1737_v28 = vld [vmem:[#allocation7_spill] sm:$0xff]  ;;  %v1740_v17 = vld [vmem:[#allocation9_spill] sm:$0xff] }
 0x169   :  { %v370_v49 = vsub.f32 %v1736_v33, %v1350_v15  ;;  %v513_v37 = vadd.f32 %v749_v54, %v512_v63  ;;  %776 = vpow2.f32 %v465_v43  ;;  %v495_v0 = vmul.f32 1.442695, %v369_v25  ;;  %v755_v61 = vpop.eup %754  ;;  %v1741_v63 = vld [vmem:[#allocation11_spill] sm:$0xff]  ;;  %v1744_v54 = vld [vmem:[#allocation12_spill] sm:$0xff] }
 0x16a   :  { %v562_v50 = vadd.f32 %v733_v62, %v731_v46  ;;  %506 = vadd.xlane.f32.xlu1 %v505_v27  ;;  %v521_v57 = vadd.f32 %v751_v45, %v520_v60  ;;  %778 = vpow2.f32 %v479_v34  ;;  %v554_v55 = vadd.f32 %v1461_v32, %v553_v6  ;;  %v757_v18 = vpop.eup %756  ;;  %v1738_v34 = vld [vmem:[#allocation8_spill] sm:$0xff]  ;;  %v1747_v45 = vld [vmem:[#allocation14_spill] sm:$0xff] }
 0x16b   :  { %v514_v15 = vadd.f32 %v753_v39, %v513_v37  ;;  %v546_v10 = vadd.f32 %v1439_v16, %v545_v7  ;;  %780 = vpow2.f32 %v493_v1  ;;  %v497_v14 = vmul.f32 1.442695, %v370_v49  ;;  %v1743_v1 = vld [vmem:[#allocation10_spill] sm:$0xff]  ;;  %v1750_v39 = vld [vmem:[#allocation16_spill] sm:$0xff] }
 0x16c   :  { %v522_v4 = vadd.f32 %v755_v61, %v521_v57  ;;  %v538_v36 = vadd.f32 %v1413_v24, %v537_v52  ;;  %782 = vpow2.f32 %v481_v22  ;;  %v759_v48 = vpop.eup %758  ;;  %v530_v46 = vadd.f32 %v757_v18, %v529_v5  ;;  %v1746_v22 = vld [vmem:[#allocation13_spill] sm:$0xff] }
 0x16d   :  { %515 = vadd.xlane.f32.xlu0 %v514_v15  ;;  %784 = vpow2.f32 %v495_v0  ;;  %v563_v47 = vadd.f32 %v1486_v9, %v562_v50  ;;  %v761_v62 = vpop.eup %760  ;;  %v555_v32 = vadd.f32 %v1467_v8, %v554_v55  ;;  %v547_v16 = vadd.f32 %v1445_v19, %v546_v10  ;;  %v1749_v50 = vld [vmem:[#allocation15_spill] sm:$0xff]  ;;  %v1752_v61 = vld [vmem:[#allocation17_spill] sm:$0xff]  ;;  %v1753_v15 = vld [vmem:[#allocation18_spill] sm:$0xff] }
 0x16e   :  { %v523_v51 = vadd.f32 %v759_v48, %v522_v4  ;;  %v763_v42 = vpop.eup %762  ;;  %v531_v59 = vadd.f32 %v761_v62, %v530_v46  ;;  %786 = vpow2.f32 %v497_v14  ;;  %v1742_v33 = vsub.f32 %v1740_v17, %v1741_v63  ;;  %v227_v4 = vld [vmem:[#allocation3] sm:$0xff]  ;;  %v1756_v48 = vld [vmem:[#allocation20_spill] sm:$0xff]  ;;  %v234_v63 = vld [vmem:[#allocation3 + $0x38] sm:$0xff] }
 0x16f   :  { %v765_v44 = vpop.eup %764  ;;  %v539_v29 = vadd.f32 %v763_v42, %v538_v36  ;;  %v564_v23 = vadd.f32 %v1492_v21, %v563_v47  ;;  %v556_v9 = vadd.f32 %v1473_v3, %v555_v32  ;;  %v1745_v27 = vsub.f32 %v1743_v1, %v1744_v54  ;;  %v1755_v36 = vld [vmem:[#allocation19_spill] sm:$0xff]  ;;  %v228_v32 = vld [vmem:[#allocation3 + $0x8] sm:$0xff]  ;;  %v1758_v42 = vld [vmem:[#allocation21_spill] sm:$0xff] }
 0x170   :  { %v767_v41 = vpop.eup %766  ;;  %v532_v24 = vadd.f32 %v765_v44, %v531_v59  ;;  %v245_v49 = vmul.f32 1.442695, %v1742_v33  ;;  %v1748_v37 = vsub.f32 %v1746_v22, %v1747_v45  ;;  %v1751_v57 = vsub.f32 %v1749_v50, %v1750_v39  ;;  %v1759_v59 = vld [vmem:[#allocation22_spill] sm:$0xff]  ;;  %v599_v50 = vld [vmem:[#allocation2] sm:$0xff] }
 0x171   :  { %524 = vadd.xlane.f32.xlu0 %v523_v51  ;;  %v769_v60 = vpop.eup %768  ;;  %v540_v30 = vadd.f32 %v767_v41, %v539_v29  ;;  %v565_v19 = vadd.f32 %v1500_v38, %v564_v23  ;;  %v1739_v38 = vsub.f32 %v1737_v28, %v1738_v34  ;;  %v247_v52 = vmul.f32 1.442695, %v1745_v27 }
 0x172   :  { %533 = vadd.xlane.f32.xlu1 %v532_v24  ;;  %v548_v35 = vadd.f32 %v769_v60, %v547_v16  ;;  %v249_v0 = vmul.f32 1.442695, %v1748_v37  ;;  %v251_v55 = vmul.f32 1.442695, %v1751_v57  ;;  %v1754_v10 = vsub.f32 %v1752_v61, %v1753_v15  ;;  %v600_v15 = vld [vmem:[#allocation2 + $0x8] sm:$0xff] }
 0x173   :  { %v771_v40 = vpop.eup %770  ;;  %v243_v6 = vmul.f32 1.442695, %v1739_v38  ;;  %v1757_v46 = vsub.f32 %v1755_v36, %v1756_v48  ;;  %v1760_v16 = vsub.f32 %v1758_v42, %v1759_v59  ;;  %v601_v48 = vld [vmem:[#allocation2 + $0x10] sm:$0xff]  ;;  %v603_v59 = vld [vmem:[#allocation2 + $0x20] sm:$0xff] }
 0x174   :  { %v773_v8 = vpop.eup %772  ;;  %v541_v11 = vadd.f32 %v771_v40, %v540_v30  ;;  %v253_v14 = vmul.f32 1.442695, %v1754_v10  ;;  %v229_v30 = vld [vmem:[#allocation3 + $0x10] sm:$0xff] }
 0x175   :  { %v775_v5 = vpop.eup %774  ;;  %v549_v53 = vadd.f32 %v773_v8, %v548_v35  ;;  %788 = vpow2.f32 %v243_v6  ;;  %v255_v47 = vmul.f32 1.442695, %v1757_v46  ;;  %v257_v44 = vmul.f32 1.442695, %v1760_v16  ;;  %v230_v35 = vld [vmem:[#allocation3 + $0x18] sm:$0xff] }
 0x176   :  { %v777_v13 = vpop.eup %776  ;;  %542 = vadd.xlane.f32.xlu0 %v541_v11  ;;  %v557_v2 = vadd.f32 %v775_v5, %v556_v9  ;;  %790 = vpow2.f32 %v245_v49 }
 0x177   :  { %v779_v58 = vpop.eup %778  ;;  %v550_v12 = vadd.f32 %v777_v13, %v549_v53  ;;  %792 = vpow2.f32 %v247_v52  ;;  %v231_v13 = vld [vmem:[#allocation3 + $0x20] sm:$0xff] }
 0x178   :  { %v781_v31 = vpop.eup %780  ;;  %v558_v21 = vadd.f32 %v779_v58, %v557_v2  ;;  %794 = vpow2.f32 %v249_v0 }
 0x179   :  { %v783_v20 = vpop.eup %782  ;;  %551 = vadd.xlane.f32.xlu1 %v550_v12  ;;  %v566_v43 = vadd.f32 %v781_v31, %v565_v19  ;;  %796 = vpow2.f32 %v251_v55 }
 0x17a   :  { %v785_v3 = vpop.eup %784  ;;  %v559_v7 = vadd.f32 %v783_v20, %v558_v21  ;;  %798 = vpow2.f32 %v253_v14  ;;  %v232_v20 = vld [vmem:[#allocation3 + $0x28] sm:$0xff] }
 0x17b   :  { %v567_v26 = vadd.f32 %v785_v3, %v566_v43  ;;  %v787_v25 = vpop.eup %786  ;;  %800 = vpow2.f32 %v255_v47 }
 0x17c   :  { %560 = vadd.xlane.f32.xlu0 %v559_v7  ;;  %802 = vpow2.f32 %v257_v44 }
 0x17d   :  { %v568_v56 = vadd.f32 %v787_v25, %v567_v26 }
 0x17f   :  { %569 = vadd.xlane.f32.xlu1 %v568_v56  ;;  %v233_v56 = vld [vmem:[#allocation3 + $0x30] sm:$0xff] }
 0x182   :  { %v789_v18 = vpop.eup %788 }
 0x183   :  { %v791_v62 = vpop.eup %790  ;;  %v259_v51 = vmul.f32 %v789_v18, %v227_v4 }
 0x184   :  { %v260_v24 = vmul.f32 %v791_v62, %v228_v32  ;;  %v793_v23 = vpop.eup %792  ;;  %v602_v62 = vld [vmem:[#allocation2 + $0x18] sm:$0xff] }
 0x185   :  { %v795_v40 = vpop.eup %794  ;;  %v261_v8 = vmul.f32 %v793_v23, %v229_v30  ;;  %v605_v30 = vld [vmem:[#allocation2 + $0x30] sm:$0xff] }
 0x186   :  { %v797_v5 = vpop.eup %796  ;;  %v262_v19 = vmul.f32 %v795_v40, %v230_v35 }
 0x187   :  { %v799_v31 = vpop.eup %798  ;;  %v263_v21 = vmul.f32 %v797_v5, %v231_v13 }
 0x188   :  { %v801_v26 = vpop.eup %800  ;;  %v264_v25 = vmul.f32 %v799_v31, %v232_v20 }
 0x189   :  { %v803_v38 = vpop.eup %802  ;;  %v265_v17 = vmul.f32 %v801_v26, %v233_v56 }
 0x18a   :  { %v266_v54 = vmul.f32 %v803_v38, %v234_v63 }
 0x1f3   :  { %v507_v29 = vpop.xlane.xlu1 %506 }
 0x1f4   :  { %v571_v41 = vadd.f32 %v507_v29, %v259_v51 }
 0x1f6   :  { %580 = vst.msk [vmem:[#allocation3] sm:$0xff] %vm26_vm0, %v571_v41  ;;  %v516_v60 = vpop.xlane.xlu0 %515  ;;  %v604_v41 = vld [vmem:[#allocation2 + $0x28] sm:$0xff] }
 0x1f7   :  { %v572_v9 = vadd.f32 %v516_v60, %v260_v24 }
 0x1f9   :  { %581 = vst.msk [vmem:[#allocation3 + $0x8] sm:$0xff] %vm26_vm0, %v572_v9 }
 0x1fa   :  { %v525_v11 = vpop.xlane.xlu0 %524 }
 0x1fb   :  { %v573_v53 = vadd.f32 %v525_v11, %v261_v8  ;;  %v534_v2 = vpop.xlane.xlu1 %533  ;;  %v606_v8 = vld [vmem:[#allocation2 + $0x38] sm:$0xff] }
 0x1fc   :  { %v574_v12 = vadd.f32 %v534_v2, %v262_v19 }
 0x1fd   :  { %v607_v58 = vld [vmem:[#allocation3] sm:$0xff]  ;;  %582 = vst.msk [vmem:[#allocation3 + $0x10] sm:$0xff] %vm26_vm0, %v573_v53 }
 0x1fe   :  { %804 = vlog2.f32 %v607_v58  ;;  %583 = vst.msk [vmem:[#allocation3 + $0x18] sm:$0xff] %vm26_vm0, %v574_v12 }
 0x1ff   :  { %v543_v43 = vpop.xlane.xlu0 %542 }
 0x200   :  { %v608_v3 = vld [vmem:[#allocation3 + $0x8] sm:$0xff]  ;;  %v575_v7 = vadd.f32 %v543_v43, %v263_v21 }
 0x201   :  { %806 = vlog2.f32 %v608_v3 }
 0x202   :  { %584 = vst.msk [vmem:[#allocation3 + $0x20] sm:$0xff] %vm26_vm0, %v575_v7  ;;  %v552_v28 = vpop.xlane.xlu1 %551 }
 0x203   :  { %v576_v34 = vadd.f32 %v552_v28, %v264_v25 }
 0x204   :  { %v609_v6 = vld [vmem:[#allocation3 + $0x10] sm:$0xff] }
 0x205   :  { %808 = vlog2.f32 %v609_v6  ;;  %585 = vst.msk [vmem:[#allocation3 + $0x28] sm:$0xff] %vm26_vm0, %v576_v34  ;;  %v561_v33 = vpop.xlane.xlu0 %560  ;;  %v610_v49 = vld [vmem:[#allocation3 + $0x18] sm:$0xff] }
 0x206   :  { %v577_v1 = vadd.f32 %v561_v33, %v265_v17  ;;  %810 = vlog2.f32 %v610_v49 }
 0x208   :  { %586 = vst.msk [vmem:[#allocation3 + $0x30] sm:$0xff] %vm26_vm0, %v577_v1  ;;  %v570_v27 = vpop.xlane.xlu1 %569 }
 0x209   :  { %v611_v52 = vld [vmem:[#allocation3 + $0x20] sm:$0xff]  ;;  %v578_v22 = vadd.f32 %v570_v27, %v266_v54 }
 0x20a   :  { %812 = vlog2.f32 %v611_v52 }
 0x20b   :  { %v805_v45 = vpop.eup %804  ;;  %587 = vst.msk [vmem:[#allocation3 + $0x38] sm:$0xff] %vm26_vm0, %v578_v22 }
 0x20c   :  { %v616_v37 = vmul.f32 0.6931472, %v805_v45  ;;  %v612_v0 = vld [vmem:[#allocation3 + $0x28] sm:$0xff] }
 0x20d   :  { %814 = vlog2.f32 %v612_v0 }
 0x20e   :  { %v807_v39 = vpop.eup %806  ;;  %v631_v57 = vadd.f32 %v616_v37, %v599_v50 }
 0x20f   :  { %v618_v55 = vmul.f32 0.6931472, %v807_v39  ;;  %v613_v61 = vld [vmem:[#allocation3 + $0x30] sm:$0xff] }
 0x210   :  { %639 = vst.msk [vmem:[%s1588_s1] sm:$0xff] %vm26_vm0, %v631_v57  ;;  %816 = vlog2.f32 %v613_v61 }
 0x211   :  { %v632_v10 = vadd.f32 %v618_v55, %v600_v15 }
 0x212   :  { %v809_v14 = vpop.eup %808  ;;  %v614_v18 = vld [vmem:[#allocation3 + $0x38] sm:$0xff] }
 0x213   :  { %640 = vst.msk [vmem:[%s1588_s1 + $0x8] sm:$0xff] %vm26_vm0, %v632_v10  ;;  %v620_v4 = vmul.f32 0.6931472, %v809_v14  ;;  %818 = vlog2.f32 %v614_v18  ;;  %v811_v36 = vpop.eup %810 }
 0x214   :  { %v622_v47 = vmul.f32 0.6931472, %v811_v36 }
 0x215   :  { %v633_v46 = vadd.f32 %v620_v4, %v601_v48 }
 0x216   :  { %v634_v32 = vadd.f32 %v622_v47, %v602_v62 }
 0x217   :  { %v813_v51 = vpop.eup %812  ;;  %641 = vst.msk [vmem:[%s1588_s1 + $0x10] sm:$0xff] %vm26_vm0, %v633_v46 }
 0x218   :  { %v624_v42 = vmul.f32 0.6931472, %v813_v51  ;;  %642 = vst.msk [vmem:[%s1588_s1 + $0x18] sm:$0xff] %vm26_vm0, %v634_v32 }
 0x21a   :  { %v815_v16 = vpop.eup %814  ;;  %v635_v44 = vadd.f32 %v624_v42, %v603_v59 }
 0x21b   :  { %v626_v29 = vmul.f32 0.6931472, %v815_v16 }
 0x21c   :  { %643 = vst.msk [vmem:[%s1588_s1 + $0x20] sm:$0xff] %vm26_vm0, %v635_v44 }
 0x21d   :  { %v817_v24 = vpop.eup %816  ;;  %v636_v23 = vadd.f32 %v626_v29, %v604_v41 }
 0x21e   :  { %v628_v60 = vmul.f32 0.6931472, %v817_v24 }
 0x21f   :  { %644 = vst.msk [vmem:[%s1588_s1 + $0x28] sm:$0xff] %vm26_vm0, %v636_v23 }
 0x220   :  { %v819_v9 = vpop.eup %818  ;;  %v637_v40 = vadd.f32 %v628_v60, %v605_v30 }
 0x221   :  { %v630_v35 = vmul.f32 0.6931472, %v819_v9 }
 0x222   :  { %645 = vst.msk [vmem:[%s1588_s1 + $0x30] sm:$0xff] %vm26_vm0, %v637_v40 }
 0x223   :  { %v638_v11 = vadd.f32 %v630_v35, %v606_v8 }
 0x225   :  { %646 = vst.msk [vmem:[%s1588_s1 + $0x38] sm:$0xff] %vm26_vm0, %v638_v11 }
 0x226   :  { %651 = vsyncpa [#allocation5], 1 }

</bundles_post_ra>
